<compile_context>
chip_gen: v7x
topology: tpu7x:2x2x1
jax: 0.10.0
libtpu: 0.0.40
codegen_flags: <defaults>
</compile_context>

<pallas_src>
import jax
import jax.numpy as jnp
from jax.experimental import pallas as pl
from jax.experimental.pallas import tpu as pltpu


_MAX_BATCH_TILE = 512  # rows; ~2 MiB f32 activations + 256 KiB out per buffer at d_in=1024


def _round_up(x, m):
    return ((x + m - 1) // m) * m


def _policy_mlp_kernel(x_ref, w1_ref, b1_ref, w2_ref, b2_ref, out_ref):
    """Fused 2-layer MLP policy head for one batch tile.

    x_ref  : (TB, D_in)   f32  VMEM  (batch tile, pipelined over the grid)
    w1_ref : (D_in, H)    bf16 VMEM  (whole array, single resident copy)
    b1_ref : (1, H)       f32  VMEM  (resident)
    w2_ref : (H, A_pad)   bf16 VMEM  (resident; A_pad = lane-dense 128-multiple)
    b2_ref : (1, A_pad)   f32  VMEM  (resident)
    out_ref: (TB, A_pad)  f32  VMEM
    """
    # In-kernel f32 -> bf16 cast: cheap VPU pack hidden under the activation DMA
    # (avoids a separate wrapper cast kernel + a second HBM pass over x).
    x = x_ref[...].astype(jnp.bfloat16)
    # Layer 1: bf16 MXU matmul with f32 accumulation; bias + ReLU in f32 on the
    # VPU (keeps v5e happy: its VPU has no bf16 path).
    h = jnp.dot(x, w1_ref[...], preferred_element_type=jnp.float32)
    h = jnp.maximum(h + b1_ref[...], 0.0)
    # Layer 2: bf16 MXU matmul -> lane-dense padded logits, bias add in f32.
    logits = jnp.dot(h.astype(w2_ref.dtype), w2_ref[...],
                     preferred_element_type=jnp.float32)
    out_ref[...] = (logits + b2_ref[...]).astype(out_ref.dtype)


def prepare_params(raw_params):
    """One-time (weight-update-time) conversion to the kernel's device layout.

    Pre-casts the MXU operands to bf16 and zero-pads the action dimension to a
    multiple of 128 lanes so the second matmul's output stores are unmasked.
    Keeping this off the per-step path removes several tiny XLA launches and
    ~300 KiB of redundant HBM traffic every forward call.
    """
    w1 = raw_params["w1"].astype(jnp.bfloat16)
    b1 = raw_params["b1"].reshape(1, -1).astype(jnp.float32)
    w2 = raw_params["w2"]
    b2 = raw_params["b2"]
    n_act = w2.shape[1]
    a_pad = _round_up(n_act, 128)
    if a_pad != n_act:
        w2 = jnp.pad(w2, ((0, 0), (0, a_pad - n_act)))
        b2 = jnp.pad(b2, (0, a_pad - n_act))
    return {
        "w1": w1,
        "b1": b1,
        "w2": w2.astype(jnp.bfloat16),
        "b2": b2.reshape(1, -1).astype(jnp.float32),
    }


def distributed_policy_forward(obs_nchw, params, n_actions):
    """Forward pass of the (concrete) DistributedPolicy.

    obs_nchw : (B, C, H, W) float32, PyTorch NCHW layout.
    params   : prepare_params() output (bf16 w1/w2, f32 b1/b2, action dim padded).
    returns  : (B, n_actions) action logits, float32.
    """
    B = obs_nchw.shape[0]
    # Glue: flatten exactly like torch `obs.flatten(1)` (row-major over C,H,W).
    # Stays f32 — the bf16 cast happens inside the kernel.
    x = obs_nchw.reshape(B, -1)

    w1, b1, w2, b2 = params["w1"], params["b1"], params["w2"], params["b2"]
    d_in, hid = w1.shape
    a_pad = w2.shape[1]
    assert x.shape[1] == d_in
    assert n_actions <= a_pad

    # Batch tile: whole batch if it fits under the cap (full-extent block, no
    # padding, no partial blocks); otherwise 512-row tiles with a partial last
    # block (OOB input rows are garbage, OOB output stores are masked, and only
    # rows < B are returned).  No jnp.pad of x on the per-step path.
    tb = B if B <= _MAX_BATCH_TILE else _MAX_BATCH_TILE
    grid = (pl.cdiv(B, tb),)

    cost = pl.CostEstimate(
        flops=2 * B * (d_in * hid + hid * a_pad),
        transcendentals=0,
        bytes_accessed=(x.size * 4 + w1.size * 2 + w2.size * 2
                        + b1.size * 4 + b2.size * 4 + B * a_pad * 4),
    )

    out = pl.pallas_call(
        _policy_mlp_kernel,
        out_shape=jax.ShapeDtypeStruct((B, a_pad), jnp.float32),
        grid=grid,
        in_specs=[
            # Activations: tiled over the batch axis (double-buffered by Pallas).
            pl.BlockSpec((tb, d_in), lambda i: (i, 0)),
            # Weights / biases: whole arrays resident in VMEM for the entire
            # kernel (single copy, no per-tile DMA, no double buffering).
            pl.BlockSpec(memory_space=pltpu.MemorySpace.VMEM),
            pl.BlockSpec(memory_space=pltpu.MemorySpace.VMEM),
            pl.BlockSpec(memory_space=pltpu.MemorySpace.VMEM),
            pl.BlockSpec(memory_space=pltpu.MemorySpace.VMEM),
        ],
        out_specs=pl.BlockSpec((tb, a_pad), lambda i: (i, 0)),
        compiler_params=pltpu.CompilerParams(
            # Batch tiles are independent -> megacore sharding on v7x when the
            # grid has >= 2 tiles; harmless no-op for tiny inference batches.
            dimension_semantics=("parallel",),
        ),
        cost_estimate=cost,
    )(x, w1, b1, w2, b2)

    # Strip the lane padding on the action dim outside the kernel.
    return out[:, :n_actions]


def init_raw_params(key, d_in, hidden, n_actions):
    """Deterministic f32 parameter init (mimics nn.Linear default ranges)."""
    k1, k2, k3, k4 = jax.random.split(key, 4)
    lim1 = 1.0 / jnp.sqrt(d_in)
    lim2 = 1.0 / jnp.sqrt(hidden)
    return {
        "w1": jax.random.uniform(k1, (d_in, hidden), jnp.float32, -lim1, lim1),
        "b1": jax.random.uniform(k2, (hidden,), jnp.float32, -lim1, lim1),
        "w2": jax.random.uniform(k3, (hidden, n_actions), jnp.float32, -lim2, lim2),
        "b2": jax.random.uniform(k4, (n_actions,), jnp.float32, -lim2, lim2),
    }


if __name__ == "__main__":
    # Small shapes consistent with the module's interface:
    #   collector.state_shape = (4, 16, 16)  -> obs (B, 4, 16, 16), NCHW
    #   collector.out_action  = 8            -> logits (B, 8)
    B, C, H, W = 2, 4, 16, 16
    HIDDEN = 128
    N_ACTIONS = 8
    D_IN = C * H * W

    key = jax.random.PRNGKey(0)
    k_obs, k_par = jax.random.split(key)
    obs = jax.random.normal(k_obs, (B, C, H, W), dtype=jnp.float32)

    raw = init_raw_params(k_par, D_IN, HIDDEN, N_ACTIONS)
    params = prepare_params(raw)  # once, off the per-step critical path

    fwd = jax.jit(lambda o, p: distributed_policy_forward(o, p, N_ACTIONS))
    logits = jax.block_until_ready(fwd(obs, params))
    assert logits.shape == (B, N_ACTIONS)

    # Pure-JAX reference with the same bf16-operand / f32-accumulate recipe.
    xb = obs.reshape(B, -1).astype(jnp.bfloat16)
    w1b = raw["w1"].astype(jnp.bfloat16)
    w2b = raw["w2"].astype(jnp.bfloat16)
    h_ref = jnp.maximum(
        jnp.dot(xb, w1b, preferred_element_type=jnp.float32) + raw["b1"], 0.0)
    ref = jnp.dot(h_ref.astype(jnp.bfloat16), w2b,
                  preferred_element_type=jnp.float32) + raw["b2"]
    assert jnp.allclose(logits, ref, atol=1e-2, rtol=1e-2)

    # Sanity-check against full-f32 math (bf16 quantization noise only).
    ref_f32 = (jnp.maximum(obs.reshape(B, -1) @ raw["w1"] + raw["b1"], 0.0)
               @ raw["w2"] + raw["b2"])
    assert jnp.allclose(logits, ref_f32, atol=5e-2, rtol=5e-2)

    # TODO(synk): act()/batch_act()/step() are abstract RL-loop hooks with no
    # tensor compute of their own; only the forward (policy head) is kernelized.
    print("KERNEL_OK")
</pallas_src>

<mosaic_0001>
module attributes {stable_mosaic.version = 11 : i64} {
  func.func @_policy_mlp_kernel(%arg0: i32, %arg1: memref<2x1024xf32, #tpu.memory_space<vmem>>, %arg2: memref<1024x128xbf16, #tpu.memory_space<vmem>>, %arg3: memref<1x128xf32, #tpu.memory_space<vmem>>, %arg4: memref<128x128xbf16, #tpu.memory_space<vmem>>, %arg5: memref<1x128xf32, #tpu.memory_space<vmem>>, %arg6: memref<2x128xf32, #tpu.memory_space<vmem>>) attributes {dimension_semantics = [#tpu.dimension_semantics<parallel>], iteration_bounds = array<i64: 1>, scalar_prefetch = 0 : i64, scratch_operands = 0 : i64, tpu.core_type = #tpu.core_type<tc>, window_params = [{transform_indices = @transform_0, window_bounds = array<i64: 2, 1024>}, {pipeline_mode = #tpu.pipeline_mode<synchronous>, transform_indices = @transform_1, window_bounds = array<i64: 1024, 128>}, {pipeline_mode = #tpu.pipeline_mode<synchronous>, transform_indices = @transform_2, window_bounds = array<i64: 1, 128>}, {pipeline_mode = #tpu.pipeline_mode<synchronous>, transform_indices = @transform_3, window_bounds = array<i64: 128, 128>}, {pipeline_mode = #tpu.pipeline_mode<synchronous>, transform_indices = @transform_4, window_bounds = array<i64: 1, 128>}, {transform_indices = @transform_5, window_bounds = array<i64: 2, 128>}]} {
    %c0 = arith.constant 0 : index
    %c0_0 = arith.constant 0 : index
    %0 = vector.load %arg1[%c0, %c0_0] : memref<2x1024xf32, #tpu.memory_space<vmem>>, vector<2x1024xf32>
    %1 = arith.truncf %0 : vector<2x1024xf32> to vector<2x1024xbf16>
    %c0_1 = arith.constant 0 : index
    %c0_2 = arith.constant 0 : index
    %2 = vector.load %arg2[%c0_1, %c0_2] : memref<1024x128xbf16, #tpu.memory_space<vmem>>, vector<1024x128xbf16>
    %cst = arith.constant dense<0.000000e+00> : vector<2x128xf32>
    %3 = tpu.matmul %1, %2, %cst {dimension_numbers = #tpu.dot_dimension_numbers<[1], [0], [0], [1], [0, 0, 1, 1], [], []>} : vector<2x1024xbf16>, vector<1024x128xbf16>, vector<2x128xf32> -> vector<2x128xf32>
    %c0_3 = arith.constant 0 : index
    %c0_4 = arith.constant 0 : index
    %4 = vector.load %arg3[%c0_3, %c0_4] : memref<1x128xf32, #tpu.memory_space<vmem>>, vector<1x128xf32>
    %5 = vector.broadcast %4 : vector<1x128xf32> to vector<2x128xf32>
    %6 = arith.addf %3, %5 : vector<2x128xf32>
    %cst_5 = arith.constant 0.000000e+00 : f32
    %7 = vector.broadcast %cst_5 : f32 to vector<2x128xf32>
    %8 = arith.maximumf %6, %7 : vector<2x128xf32>
    %9 = arith.truncf %8 : vector<2x128xf32> to vector<2x128xbf16>
    %c0_6 = arith.constant 0 : index
    %c0_7 = arith.constant 0 : index
    %10 = vector.load %arg4[%c0_6, %c0_7] : memref<128x128xbf16, #tpu.memory_space<vmem>>, vector<128x128xbf16>
    %cst_8 = arith.constant dense<0.000000e+00> : vector<2x128xf32>
    %11 = tpu.matmul %9, %10, %cst_8 {dimension_numbers = #tpu.dot_dimension_numbers<[1], [0], [0], [1], [0, 0, 1, 1], [], []>} : vector<2x128xbf16>, vector<128x128xbf16>, vector<2x128xf32> -> vector<2x128xf32>
    %c0_9 = arith.constant 0 : index
    %c0_10 = arith.constant 0 : index
    %12 = vector.load %arg5[%c0_9, %c0_10] : memref<1x128xf32, #tpu.memory_space<vmem>>, vector<1x128xf32>
    %13 = vector.broadcast %12 : vector<1x128xf32> to vector<2x128xf32>
    %14 = arith.addf %11, %13 : vector<2x128xf32>
    %c0_11 = arith.constant 0 : index
    %c0_12 = arith.constant 0 : index
    %15 = vector.load %arg6[%c0_11, %c0_12] : memref<2x128xf32, #tpu.memory_space<vmem>>, vector<2x128xf32>
    tpu.vector_store %arg6[%c0_11, %c0_12], %14 {strides = array<i32>} : memref<2x128xf32, #tpu.memory_space<vmem>>, vector<2x128xf32>,
    return
  }
  func.func @transform_0(%arg0: i32) -> (i32, i32) {
    %c0_i32 = arith.constant 0 : i32
    %c0_i32_0 = arith.constant 0 : i32
    return %arg0, %c0_i32 : i32, i32
  }
  func.func @transform_1(%arg0: i32) -> (i32, i32) {
    %c0_i32 = arith.constant 0 : i32
    %c0_i32_0 = arith.constant 0 : i32
    %c0_i32_1 = arith.constant 0 : i32
    return %c0_i32, %c0_i32_0 : i32, i32
  }
  func.func @transform_2(%arg0: i32) -> (i32, i32) {
    %c0_i32 = arith.constant 0 : i32
    %c0_i32_0 = arith.constant 0 : i32
    %c0_i32_1 = arith.constant 0 : i32
    return %c0_i32, %c0_i32_0 : i32, i32
  }
  func.func @transform_3(%arg0: i32) -> (i32, i32) {
    %c0_i32 = arith.constant 0 : i32
    %c0_i32_0 = arith.constant 0 : i32
    %c0_i32_1 = arith.constant 0 : i32
    return %c0_i32, %c0_i32_0 : i32, i32
  }
  func.func @transform_4(%arg0: i32) -> (i32, i32) {
    %c0_i32 = arith.constant 0 : i32
    %c0_i32_0 = arith.constant 0 : i32
    %c0_i32_1 = arith.constant 0 : i32
    return %c0_i32, %c0_i32_0 : i32, i32
  }
  func.func @transform_5(%arg0: i32) -> (i32, i32) {
    %c0_i32 = arith.constant 0 : i32
    %c0_i32_0 = arith.constant 0 : i32
    return %arg0, %c0_i32 : i32, i32
  }
}

</mosaic_0001>

<bundles_post_ra>
// kernel: _lambda_.1
= control target key start
LH: loop header
LB: loop body
LE: loop exit
PB: predicated region body
PF: predicated region fallthrough
CT: control target
= control target key end

     0   :  { %10 = vsyncpa [#allocation3], 0  ;;  %s1321_s0 = inlined_call_operand.vmem [shape: f32[2,1024], index: 0, kind: input, shape index: {}]   ;;  %s1322_s1 = inlined_call_operand.hbm [shape: bf16[1024,128], index: 1, kind: input, shape index: {}]   ;;  %s1323_s2 = inlined_call_operand.vmem [shape: f32[1,128], index: 2, kind: input, shape index: {}]   ;;  %s1324_s3 = inlined_call_operand.vmem [shape: bf16[128,128], index: 3, kind: input, shape index: {}]   ;;  %s1325_s4 = inlined_call_operand.vmem [shape: f32[1,128], index: 4, kind: input, shape index: {}]   ;;  %s1326_s5 = inlined_call_operand.hbm [shape: f32[2,128], index: 5, kind: output, shape index: {}]  }
   0x1   :  { %11 = vsyncpa [#allocation4], 0  ;;  %s1218_s18 = smov [#allocation2]   ;;  %s1170_s22 = scalar_lea.hbm %s1322_s1, 8192 }
   0x2   :  { %s19_s19 = sshll.u32 %s1218_s18, 4  ;;  %p1171_p0 = scmp.ne.s32.totalorder %s1322_s1, %s1170_s22  ;;  %s20_s19 = int_to_ptr.vmem [resolvable:$true] %s19_s19 }
   0x3   :  { %p1174_p1 = scmp.lt.u32.totalorder %s1170_s22, %s1322_s1 }
   0x5   :  { %p1176_p2 = pnand %p1174_p1, %p1171_p0 }
   0x7   :  { %1179 = shalt.err (!%p1176_p2)
}
   0x8   :  { %s1180_s27 = scalar_lea.vmem %s20_s19, 8192  ;;  %p1185_p4 = scmp.lt.s32.totalorder %s20_s19, %s20_s19 }
   0x9   :  { %p1181_p3 = scmp.ne.s32.totalorder %s20_s19, %s1180_s27  ;;  %p1186_p5 = scmp.lt.s32.totalorder %s1180_s27, %s1180_s27 }
   0xb   :  { %p1187_p6 = por %p1186_p5, %p1185_p4 }
   0xd   :  { %p1188_p7 = pnand %p1187_p6, %p1181_p3 }
   0xf   :  { %1191 = shalt.err (!%p1188_p7)
}
  0x10   :  { %s1219_s28 = smov 64   ;;  %s1220_s29 = smov 4  }
  0x11   :  { %25 = dma.hbm_to_vmem [thread:$0]  %s1322_s1, 8192, %s20_s19, [#allocation3], %s1219_s28, %s1219_s28, %s1220_s29  }
  0x12   :  { %1214 = dma.done.wait [#allocation3], 8192  }
  0x13   :  { %1215 = vsyncadd [#allocation3], 4294959104  ;;  %v1096_v0 = vld [vmem:[#allocation2 + $0x40] sm:$0xff]   ;;  %v1100_v4 = vld [vmem:[#allocation2 + $0x48] sm:$0xff]   ;;  %v1221_v22 = vmov 1983009808   ;;  %v44_v24 = vlaneseq }
  0x14   :  { %v1097_v1 = vld [vmem:[#allocation2 + $0xc0] sm:$0xff]   ;;  %972 = vmatprep.subr.bf16.mxu0 %v1096_v0  ;;  %v1101_v5 = vld [vmem:[#allocation2 + $0xc8] sm:$0xff]   ;;  %v1104_v8 = vld [vmem:[#allocation2 + $0x50] sm:$0xff]   ;;  %v42_v23 = vunpack.c.l.s4 %v1221_v22  ;;  %vm1223_vm0 = vmmov 0   ;;  %s1224_s27 = smov [#allocation5]  }
  0x15   :  { %v1098_v2 = vld [vmem:[#allocation2] sm:$0xff]   ;;  %994 = vmatprep.subr.bf16.mxu1 %v1097_v1  ;;  %v1102_v6 = vld [vmem:[#allocation2 + $0x8] sm:$0xff]   ;;  %v1105_v9 = vld [vmem:[#allocation2 + $0xd0] sm:$0xff]   ;;  %v45_v30 = vshrl.u32 %v44_v24, 7  ;;  %s889_s28 = sshll.u32 %s1224_s27, 4  ;;  %s890_s28 = int_to_ptr.vmem [resolvable:$true] %s889_s28 }
  0x16   :  { %v1099_v3 = vld [vmem:[#allocation2 + $0x80] sm:$0xff]   ;;  %973 = vmatpush3.bf16.msra.mxu0 %v1098_v2  ;;  %v1103_v7 = vld [vmem:[#allocation2 + $0x88] sm:$0xff]   ;;  %v1106_v10 = vld [vmem:[#allocation2 + $0x10] sm:$0xff]   ;;  %v43_v29 = vunpack.c.0.s8 %v42_v23  ;;  %s1192_s29 = scalar_lea.vmem %s890_s28, 32  ;;  %p1197_p9 = scmp.lt.s32.totalorder %s890_s28, %s890_s28 }
  0x17   :  { %995 = vmatpush3.bf16.msra.mxu1 %v1099_v3  ;;  %974 = vmatprep.subr.bf16.mxu0 %v1100_v4  ;;  %v1107_v11 = vld [vmem:[#allocation2 + $0x90] sm:$0xff]   ;;  %v1108_v12 = vld [vmem:[#allocation2 + $0x58] sm:$0xff]   ;;  %v1112_v16 = vld [vmem:[#allocation2 + $0x60] sm:$0xff]   ;;  %p1193_p8 = scmp.ne.s32.totalorder %s890_s28, %s1192_s29  ;;  %p1198_p10 = scmp.lt.s32.totalorder %s1192_s29, %s1192_s29 }
  0x18   :  { %996 = vmatprep.subr.bf16.mxu1 %v1101_v5  ;;  %v1109_v13 = vld [vmem:[#allocation2 + $0xd8] sm:$0xff]   ;;  %v1113_v17 = vld [vmem:[#allocation2 + $0xe0] sm:$0xff]   ;;  %v1116_v20 = vld [vmem:[#allocation2 + $0x68] sm:$0xff]   ;;  %v1267_v35 = vsub.s32 %v43_v29, %v45_v30 }
  0x19   :  { %v1110_v14 = vld [vmem:[#allocation2 + $0x18] sm:$0xff]   ;;  %v1114_v18 = vld [vmem:[#allocation2 + $0x20] sm:$0xff]   ;;  %v1117_v21 = vld [vmem:[#allocation2 + $0xe8] sm:$0xff]   ;;  %p1199_p11 = por %p1198_p10, %p1197_p9 }
  0x1a   :  { %975 = vmatpush3.bf16.msra.mxu0 %v1102_v6  ;;  %v1111_v15 = vld [vmem:[#allocation2 + $0x98] sm:$0xff]   ;;  %v1115_v19 = vld [vmem:[#allocation2 + $0xa0] sm:$0xff]   ;;  %v1118_v25 = vld [vmem:[#allocation2 + $0x28] sm:$0xff]  }
  0x1b   :  { %997 = vmatpush3.bf16.msra.mxu1 %v1103_v7  ;;  %976 = vmatprep.subr.bf16.mxu0 %v1104_v8  ;;  %v1119_v26 = vld [vmem:[#allocation2 + $0xa8] sm:$0xff]   ;;  %v1120_v27 = vld [vmem:[#allocation2 + $0x70] sm:$0xff]   ;;  %v1124_v33 = vld [vmem:[#allocation2 + $0x78] sm:$0xff]   ;;  %p1200_p12 = pnand %p1199_p11, %p1193_p8 }
  0x1c   :  { %998 = vmatprep.subr.bf16.mxu1 %v1105_v9  ;;  %v1121_v28 = vld [vmem:[#allocation2 + $0xf0] sm:$0xff]   ;;  %v1125_v34 = vld [vmem:[#allocation2 + $0xf8] sm:$0xff]   ;;  %v36_v38 = vld [vmem:[%s1321_s0] sm:$0xff] }
  0x1d   :  { %v1122_v31 = vld [vmem:[#allocation2 + $0x30] sm:$0xff]   ;;  %v1126_v36 = vld [vmem:[#allocation2 + $0x38] sm:$0xff]   ;;  %v47_v39 = vrot.slane %v36_v38, %v1267_v35  ;;  %v40_v40 = vcombine.high %v36_v38, %v36_v38  ;;  %v1129_v41 = vld [vmem:[#allocation2 + $0x140] sm:$0xff]  }
  0x1e   :  { %977 = vmatpush3.bf16.msra.mxu0 %v1106_v10  ;;  %v1123_v32 = vld [vmem:[#allocation2 + $0xb0] sm:$0xff]   ;;  %v1127_v37 = vld [vmem:[#allocation2 + $0xb8] sm:$0xff]   ;;  %v1130_v42 = vld [vmem:[#allocation2 + $0x1c0] sm:$0xff]  }
  0x1f   :  { %999 = vmatpush3.bf16.msra.mxu1 %v1107_v11  ;;  %978 = vmatprep.subr.bf16.mxu0 %v1108_v12  ;;  %v55_v43 = vcombine.high %v47_v39, %v47_v39  ;;  %v54_v44 = vrot.slane %v40_v40, %v1267_v35  ;;  %v82_v45 = vpack.c.bf16 %v47_v39, %v47_v39  ;;  %v1131_v46 = vld [vmem:[#allocation2 + $0x100] sm:$0xff]   ;;  %v1133_v51 = vld [vmem:[#allocation2 + $0x148] sm:$0xff]   ;;  %v1137_v56 = vld [vmem:[#allocation2 + $0x150] sm:$0xff]  }
  0x20   :  { %1000 = vmatprep.subr.bf16.mxu1 %v1109_v13  ;;  %v1132_v49 = vld [vmem:[#allocation2 + $0x180] sm:$0xff]   ;;  %v1134_v53 = vld [vmem:[#allocation2 + $0x1c8] sm:$0xff]   ;;  %v1138_v57 = vld [vmem:[#allocation2 + $0x1d0] sm:$0xff]  }
  0x21   :  { %v83_v47 = vpack.c.bf16 %v55_v43, %v55_v43  ;;  %v56_v48 = vcombine.high %v54_v44, %v54_v44  ;;  %v84_v50 = vpack.c.bf16 %v54_v44, %v54_v44  ;;  %v1135_v54 = vld [vmem:[#allocation2 + $0x108] sm:$0xff]   ;;  %v1139_v58 = vld [vmem:[#allocation2 + $0x110] sm:$0xff]   ;;  %v1141_v60 = vld [vmem:[#allocation2 + $0x158] sm:$0xff]  }
  0x22   :  { %979 = vmatpush3.bf16.msra.mxu0 %v1110_v14  ;;  %v1136_v55 = vld [vmem:[#allocation2 + $0x188] sm:$0xff]   ;;  %v1140_v59 = vld [vmem:[#allocation2 + $0x190] sm:$0xff]   ;;  %v1142_v61 = vld [vmem:[#allocation2 + $0x1d8] sm:$0xff]  }
  0x23   :  { %1001 = vmatpush3.bf16.msra.mxu1 %v1111_v15  ;;  %980 = vmatprep.subr.bf16.mxu0 %v1112_v16  ;;  %v85_v52 = vpack.c.bf16 %v56_v48, %v56_v48  ;;  %v1143_v62 = vld [vmem:[#allocation2 + $0x118] sm:$0xff]   ;;  %v1145_v0 = vld [vmem:[#allocation2 + $0x160] sm:$0xff]   ;;  %v1149_v4 = vld [vmem:[#allocation2 + $0x168] sm:$0xff]  }
  0x24   :  { %1002 = vmatprep.subr.bf16.mxu1 %v1113_v17  ;;  %641 = vmatprep.mubr.bf16.mxu0 %v83_v47  ;;  %v1144_v63 = vld [vmem:[#allocation2 + $0x198] sm:$0xff]   ;;  %v1146_v1 = vld [vmem:[#allocation2 + $0x1e0] sm:$0xff]   ;;  %v1150_v5 = vld [vmem:[#allocation2 + $0x1e8] sm:$0xff]  }
  0x25   :  { %681 = vmatprep.mubr.bf16.mxu1 %v85_v52  ;;  %v1147_v2 = vld [vmem:[#allocation2 + $0x120] sm:$0xff]   ;;  %v1151_v6 = vld [vmem:[#allocation2 + $0x128] sm:$0xff]   ;;  %v1153_v8 = vld [vmem:[#allocation2 + $0x170] sm:$0xff]  }
  0x26   :  { %981 = vmatpush3.bf16.msra.mxu0 %v1114_v18  ;;  %v1148_v3 = vld [vmem:[#allocation2 + $0x1a0] sm:$0xff]   ;;  %v1152_v7 = vld [vmem:[#allocation2 + $0x1a8] sm:$0xff]   ;;  %v1154_v9 = vld [vmem:[#allocation2 + $0x1f0] sm:$0xff]  }
  0x27   :  { %1003 = vmatpush3.bf16.msra.mxu1 %v1115_v19  ;;  %982 = vmatprep.subr.bf16.mxu0 %v1116_v20  ;;  %v1155_v10 = vld [vmem:[#allocation2 + $0x130] sm:$0xff]   ;;  %v1157_v12 = vld [vmem:[#allocation2 + $0x178] sm:$0xff]   ;;  %v37_v15 = vld [vmem:[%s1321_s0 + $0x8] sm:$0xff] }
  0x28   :  { %1004 = vmatprep.subr.bf16.mxu1 %v1117_v21  ;;  %v1156_v11 = vld [vmem:[#allocation2 + $0x1b0] sm:$0xff]   ;;  %v1158_v13 = vld [vmem:[#allocation2 + $0x1f8] sm:$0xff]   ;;  %v64_v17 = vrot.slane %v37_v15, %v1267_v35  ;;  %v57_v18 = vcombine.high %v37_v15, %v37_v15 }
  0x29   :  { %v1159_v14 = vld [vmem:[#allocation2 + $0x138] sm:$0xff]   ;;  %v1164_v29 = vld [vmem:[%s1324_s3 + $0x10] sm:$0xff]  }
  0x2a   :  { %983 = vmatpush3.bf16.msra.mxu0 %v1118_v25  ;;  %v1160_v16 = vld [vmem:[#allocation2 + $0x1b8] sm:$0xff]   ;;  %v72_v19 = vcombine.high %v64_v17, %v64_v17  ;;  %v71_v20 = vrot.slane %v57_v18, %v1267_v35  ;;  %v86_v21 = vpack.c.bf16 %v64_v17, %v64_v17 }
  0x2b   :  { %1005 = vmatpush3.bf16.msra.mxu1 %v1119_v26  ;;  %984 = vmatprep.subr.bf16.mxu0 %v1120_v27  ;;  %v1162_v26 = vld [vmem:[%s1324_s3] sm:$0xff]   ;;  %v1222_v27 = vmov 0.0   ;;  %v1165_v30 = vld [vmem:[%s1324_s3 + $0x18] sm:$0xff]  }
  0x2c   :  { %1006 = vmatprep.subr.bf16.mxu1 %v1121_v28  ;;  %v87_v22 = vpack.c.bf16 %v72_v19, %v72_v19  ;;  %v73_v23 = vcombine.high %v71_v20, %v71_v20  ;;  %v88_v24 = vpack.c.bf16 %v71_v20, %v71_v20  ;;  %v1163_v28 = vld [vmem:[%s1324_s3 + $0x8] sm:$0xff]  }
  0x2e   :  { %985 = vmatpush3.bf16.msra.mxu0 %v1122_v31  ;;  %v89_v25 = vpack.c.bf16 %v73_v23, %v73_v23  ;;  %v1166_v31 = vld [vmem:[%s1324_s3 + $0x20] sm:$0xff]  }
  0x2f   :  { %1007 = vmatpush3.bf16.msra.mxu1 %v1123_v32  ;;  %986 = vmatprep.subr.bf16.mxu0 %v1124_v33  ;;  %v1167_v32 = vld [vmem:[%s1324_s3 + $0x28] sm:$0xff]   ;;  %v1168_v33 = vld [vmem:[%s1324_s3 + $0x30] sm:$0xff]  }
  0x30   :  { %1008 = vmatprep.subr.bf16.mxu1 %v1125_v34  ;;  %v1169_v34 = vld [vmem:[%s1324_s3 + $0x38] sm:$0xff]  }
  0x32   :  { %987 = vmatpush3.bf16.msra.mxu0 %v1126_v36  ;;  %v898_v36 = vld [vmem:[%s1323_s2] ss:$0 sm:$0xff] }
  0x33   :  { %1009 = vmatpush3.bf16.msra.mxu1 %v1127_v37  ;;  %1016 = vmatprep.subr.bf16.mxu0 %v1129_v41 }
  0x34   :  { %1038 = vmatprep.subr.bf16.mxu1 %v1130_v42 }
  0x35   :  { %642 = vmatmul.mubr.bf16.vlgmr.msra.gmra.mrb[0].mxu0 %v82_v45 }
  0x36   :  { %1017 = vmatpush3.bf16.msra.mxu0 %v1131_v46  ;;  %682 = vmatmul.mubr.bf16.vlgmr.msra.gmra.mrb[0].mxu1 %v84_v50 }
  0x37   :  { %1018 = vmatprep.subr.bf16.mxu0 %v1133_v51  ;;  %1039 = vmatpush3.bf16.msra.mxu1 %v1132_v49 }
  0x38   :  { %1040 = vmatprep.subr.bf16.mxu1 %v1134_v53  ;;  %721 = vmatprep.mubr.bf16.mxu0 %v87_v22 }
  0x39   :  { %761 = vmatprep.mubr.bf16.mxu1 %v89_v25 }
  0x3a   :  { %1019 = vmatpush3.bf16.msra.mxu0 %v1135_v54 }
  0x3b   :  { %1020 = vmatprep.subr.bf16.mxu0 %v1137_v56  ;;  %1041 = vmatpush3.bf16.msra.mxu1 %v1136_v55 }
  0x3c   :  { %1042 = vmatprep.subr.bf16.mxu1 %v1138_v57 }
  0x3e   :  { %1021 = vmatpush3.bf16.msra.mxu0 %v1139_v58 }
  0x3f   :  { %1022 = vmatprep.subr.bf16.mxu0 %v1141_v60  ;;  %1043 = vmatpush3.bf16.msra.mxu1 %v1140_v59 }
  0x40   :  { %1044 = vmatprep.subr.bf16.mxu1 %v1142_v61 }
  0x42   :  { %1023 = vmatpush3.bf16.msra.mxu0 %v1143_v62  ;;  %v963_v62 = vld [vmem:[%s1325_s4] ss:$0 sm:$0xff] }
  0x43   :  { %1024 = vmatprep.subr.bf16.mxu0 %v1145_v0  ;;  %1045 = vmatpush3.bf16.msra.mxu1 %v1144_v63 }
  0x44   :  { %1046 = vmatprep.subr.bf16.mxu1 %v1146_v1 }
  0x46   :  { %1025 = vmatpush3.bf16.msra.mxu0 %v1147_v2 }
  0x47   :  { %1026 = vmatprep.subr.bf16.mxu0 %v1149_v4  ;;  %1047 = vmatpush3.bf16.msra.mxu1 %v1148_v3 }
  0x48   :  { %1048 = vmatprep.subr.bf16.mxu1 %v1150_v5 }
  0x4a   :  { %1027 = vmatpush3.bf16.msra.mxu0 %v1151_v6 }
  0x4b   :  { %1028 = vmatprep.subr.bf16.mxu0 %v1153_v8  ;;  %1049 = vmatpush3.bf16.msra.mxu1 %v1152_v7 }
  0x4c   :  { %1050 = vmatprep.subr.bf16.mxu1 %v1154_v9 }
  0x4e   :  { %1029 = vmatpush3.bf16.msra.mxu0 %v1155_v10 }
  0x4f   :  { %1030 = vmatprep.subr.bf16.mxu0 %v1157_v12  ;;  %1051 = vmatpush3.bf16.msra.mxu1 %v1156_v11 }
  0x50   :  { %1052 = vmatprep.subr.bf16.mxu1 %v1158_v13 }
  0x52   :  { %1031 = vmatpush3.bf16.msra.mxu0 %v1159_v14 }
  0x53   :  { %1053 = vmatpush3.bf16.msra.mxu1 %v1160_v16  ;;  %1069 = vmatprep.subr.bf16.mxu0 %v1222_v27 }
  0x55   :  { %722 = vmatmul.mubr.bf16.vlgmr.msra.gmra.mrb[4].mxu0 %v86_v21 }
  0x56   :  { %762 = vmatmul.mubr.bf16.vlgmr.msra.gmra.mrb[4].mxu1 %v88_v24  ;;  %1070 = vmatpush3.bf16.msra.mxu0 %v1162_v26 }
  0x57   :  { %1071 = vmatprep.subr.bf16.mxu0 %v1222_v27  ;;  %1085 = vmatprep.mubr.msk.bf16.mxu0 %vm1223_vm0, %v1222_v27 }
  0x5a   :  { %1072 = vmatpush3.bf16.msra.mxu0 %v1163_v28 }
  0x5b   :  { %1073 = vmatprep.subr.bf16.mxu0 %v1222_v27 }
  0x5e   :  { %1074 = vmatpush3.bf16.msra.mxu0 %v1164_v29 }
  0x5f   :  { %1075 = vmatprep.subr.bf16.mxu0 %v1222_v27 }
  0x62   :  { %1076 = vmatpush3.bf16.msra.mxu0 %v1165_v30 }
  0x63   :  { %1077 = vmatprep.subr.bf16.mxu0 %v1222_v27 }
  0x66   :  { %1078 = vmatpush3.bf16.msra.mxu0 %v1166_v31 }
  0x67   :  { %1079 = vmatprep.subr.bf16.mxu0 %v1222_v27 }
  0x6a   :  { %1080 = vmatpush3.bf16.msra.mxu0 %v1167_v32 }
  0x6b   :  { %1081 = vmatprep.subr.bf16.mxu0 %v1222_v27 }
  0x6e   :  { %1082 = vmatpush3.bf16.msra.mxu0 %v1168_v33 }
  0x6f   :  { %1083 = vmatprep.subr.bf16.mxu0 %v1222_v27 }
  0x72   :  { %1084 = vmatpush3.bf16.msra.mxu0 %v1169_v34 }
 0x108   :  { %v988_v35 = vpop.f32.mrb[0].mxu0 }
 0x109   :  { %v989_v37 = vpop.f32.mrb[1].mxu0  ;;  %v1010_v38 = vpop.f32.mrb[0].mxu1 }
 0x10a   :  { %v990_v39 = vadd.f32 %v989_v37, %v988_v35  ;;  %v991_v40 = vpop.f32.mrb[2].mxu0  ;;  %v1011_v41 = vpop.f32.mrb[1].mxu1 }
 0x10b   :  { %v992_v42 = vpop.f32.mrb[3].mxu0  ;;  %v1012_v44 = vadd.f32 %v1011_v41, %v1010_v38  ;;  %v1013_v45 = vpop.f32.mrb[2].mxu1 }
 0x10c   :  { %v644_v43 = vadd.f32 %v990_v39, %v898_v36  ;;  %v1014_v46 = vpop.f32.mrb[3].mxu1 }
 0x10e   :  { %v684_v47 = vadd.f32 %v1012_v44, %v644_v43 }
 0x128   :  { %v1032_v48 = vpop.f32.mrb[4].mxu0 }
 0x129   :  { %v1033_v49 = vpop.f32.mrb[5].mxu0  ;;  %v1054_v50 = vpop.f32.mrb[4].mxu1 }
 0x12a   :  { %v1034_v51 = vadd.f32 %v1033_v49, %v1032_v48  ;;  %v1035_v52 = vpop.f32.mrb[6].mxu0  ;;  %v1055_v53 = vpop.f32.mrb[5].mxu1 }
 0x12b   :  { %v1036_v54 = vpop.f32.mrb[7].mxu0  ;;  %v1056_v56 = vadd.f32 %v1055_v53, %v1054_v50  ;;  %v1057_v57 = vpop.f32.mrb[6].mxu1 }
 0x12c   :  { %v724_v55 = vadd.f32 %v1034_v51, %v684_v47  ;;  %v1058_v58 = vpop.f32.mrb[7].mxu1 }
 0x12e   :  { %v764_v59 = vadd.f32 %v1056_v56, %v724_v55 }
 0x130   :  { %v769_v60 = vmax.f32 %v764_v59, 0.0 }
 0x132   :  { %v770_v61 = vpack.c.bf16 %v769_v60, %v769_v60 }
 0x134   :  { %1086 = vmatmul.mubr.bf16.vlgmr.msra.gmra.mrb[8].mxu0 %v770_v61 }
 0x207   :  { %v876_v63 = vpop.f32.mrb[8].mxu0 }
 0x208   :  { %v877_v0 = vadd.f32 %v963_v62, %v876_v63  ;;  %v1087_v1 = vpop.f32.mrb[9].mxu0 }
 0x209   :  { %v879_v2 = vpop.f32.mrb[10].mxu0 }
 0x20a   :  { %882 = vst [vmem:[#allocation5] sm:$0x3] %v877_v0  ;;  %v1088_v3 = vpop.f32.mrb[11].mxu0 }
 0x20b   :  { %1203 = shalt.err (!%p1200_p12)
}
 0x20c   :  { %s1204_s4 = scalar_lea.hbm %s1326_s5, 32 }
 0x20d   :  { %p1205_p13 = scmp.ne.s32.totalorder %s1326_s5, %s1204_s4  ;;  %p1208_p0 = scmp.lt.u32.totalorder %s1204_s4, %s1326_s5 }
 0x20f   :  { %p1210_p1 = pnand %p1208_p0, %p1205_p13 }
 0x211   :  { %1213 = shalt.err (!%p1210_p1)
}
 0x212   :  { %892 = dma.vmem_to_hbm [thread:$0]  %s890_s28, 32, %s1326_s5, [#allocation4]  }
 0x213   :  { %1216 = dma.done.wait [#allocation4], 32  }
 0x214   :  { %1217 = vsyncadd [#allocation4], 4294967264 }
 0x215   :  { %896 = vsyncpa [#allocation3], 1 }
 0x216   :  { %897 = vsyncpa [#allocation4], 1 }

</bundles_post_ra>
